<compile_context>
chip_gen: v5e
topology: v5e:2x2
jax: 0.10.0
libtpu: 0.0.40
codegen_flags: <defaults>
</compile_context>

<pallas_src>
import functools

import jax
import jax.numpy as jnp
import numpy as np
from jax.experimental import pallas as pl
from jax.experimental.pallas import tpu as pltpu


@functools.lru_cache(maxsize=None)
def _roll_is_forward() -> bool:
    """One-time probe of pltpu.roll's direction (robust across versions).

    Returns True when pltpu.roll(x, shift=+1, axis=-1) moves elements toward
    higher indices (jnp.roll semantics), i.e. out[i] = x[(i - shift) mod n].
    """
    def probe(x_ref, o_ref):
        o_ref[...] = pltpu.roll(x_ref[...], shift=1, axis=1)

    x = jnp.tile(jnp.arange(128, dtype=jnp.float32)[None, :], (8, 1))
    out = pl.pallas_call(
        probe, out_shape=jax.ShapeDtypeStruct((8, 128), jnp.float32))(x)
    return bool(np.asarray(out)[0, 0] == 127.0)


def _shifted(x, s, n, roll_fwd):
    """y with y[..., p] == x[..., (p + s) mod n]; wrap lanes are masked by caller."""
    if s % n == 0:
        return x
    amt = (-s) % n if roll_fwd else s % n
    return pltpu.roll(x, shift=amt, axis=x.ndim - 1)


def cbam_kernel(x_ref, w1t_ref, w2_ref, colm_ref, rowm_ref, wsp_ref, o_ref, *,
                H, W, roll_fwd):
    # x_ref / o_ref : (Bt, C, HWp)  lane-dense activations (HWp % 128 == 0)
    # w1t_ref       : (1, C, Cr)    first 1x1-conv weight, transposed: [0,c,r] = w1[r,c]
    # w2_ref        : (1, C, Cr)    second 1x1-conv weight:            [0,c,r] = w2[c,r]
    # colm_ref      : (7, HWp)      column-validity masks for the 7x7 conv (shift dj-3)
    # rowm_ref      : (7, HWp)      row-validity masks    for the 7x7 conv (shift di-3)
    # wsp_ref       : (98,) SMEM    [49 'max'-channel taps, 49 'avg'-channel taps]
    Bt, C, HWp = x_ref.shape
    HW = H * W
    cc = 16 if C % 16 == 0 else (8 if C % 8 == 0 else C)

    # ---- channel gate: global average pool + (C -> Cr -> C) MLP + Hardsigmoid ----
    pooled = jnp.sum(x_ref[...].astype(jnp.float32), axis=2, keepdims=True) * (1.0 / HW)
    # hidden[b, r] = sum_c pooled[b, c] * w1[r, c]   (ONE sublane reduction, Cr on lanes)
    hid = jnp.maximum(jnp.sum(pooled * w1t_ref[...], axis=1, keepdims=True), 0.0)  # (Bt,1,Cr)
    # att[b, c] = sum_r hidden[b, r] * w2[c, r]      (ONE lane reduction)
    att = jnp.sum(hid * w2_ref[...], axis=2, keepdims=True)                        # (Bt,C,1)
    ch_att = jnp.clip(att * (1.0 / 6.0) + 0.5, 0.0, 1.0)                           # Hardsigmoid

    # ---- channel-wise max / mean of the gated activation (no staging store) ----
    mx = None
    sv = None
    for c0 in range(0, C, cc):
        xcg = x_ref[:, c0:c0 + cc, :].astype(jnp.float32) * ch_att[:, c0:c0 + cc, :]
        m_c = jnp.max(xcg, axis=1)                            # (Bt, HWp)
        s_c = jnp.sum(xcg, axis=1)
        mx = m_c if mx is None else jnp.maximum(mx, m_c)
        sv = s_c if sv is None else sv + s_c
    av = sv * (1.0 / C)

    # ---- spatial gate: 7x7 conv (pad 3) over [max, avg] in the flat lane layout ----
    col_m = colm_ref[...]
    row_m = rowm_ref[...]
    cs_mx, cs_av = [], []
    for dj in range(7):                                       # hoisted column rolls (XLU)
        s = dj - 3
        if s == 0:
            cs_mx.append(mx)
            cs_av.append(av)
        else:
            m = col_m[dj:dj + 1, :]                           # (1, HWp) 0/1 mask
            cs_mx.append(m * _shifted(mx, s, HWp, roll_fwd))
            cs_av.append(m * _shifted(av, s, HWp, roll_fwd))

    taps = [wsp_ref[i] for i in range(98)]                    # hoisted SMEM tap reads
    conv = jnp.zeros((Bt, HWp), jnp.float32)
    for di in range(7):
        terms = []
        for dj in range(7):
            terms.append(taps[di * 7 + dj] * cs_mx[dj])
            terms.append(taps[49 + di * 7 + dj] * cs_av[dj])
        while len(terms) > 1:                                 # tree sum: short add chains
            nxt = [terms[i] + terms[i + 1] for i in range(0, len(terms) - 1, 2)]
            if len(terms) % 2:
                nxt.append(terms[-1])
            terms = nxt
        acc = terms[0]
        s = (di - 3) * W                                      # one row roll per kernel row
        if s == 0:
            conv = conv + acc
        else:
            conv = conv + row_m[di:di + 1, :] * _shifted(acc, s, HWp, roll_fwd)

    sp_att = jax.nn.sigmoid(conv)[:, None, :]                 # (Bt, 1, HWp)
    sp_b = jnp.broadcast_to(sp_att, (Bt, cc, HWp))            # hoisted sublane broadcast

    # ---- fused final write: x * ch_att * sp_att, single store pass ----
    for c0 in range(0, C, cc):
        y = (x_ref[:, c0:c0 + cc, :].astype(jnp.float32)
             * ch_att[:, c0:c0 + cc, :]) * sp_b
        o_ref[:, c0:c0 + cc, :] = y.astype(o_ref.dtype)


def _vmem_footprint(bt, C, HWp, Cr, itemsize):
    """Rough per-grid-step VMEM footprint in bytes."""
    io = 2 * 2 * bt * C * HWp * itemsize       # double-buffered input + output blocks
    planes = 24 * bt * HWp * 4                 # mx/av + 14 shifted planes + conv temps
    gate = 8 * bt * C * 4                      # pooled / MLP / ch_att temps
    consts = (2 * 7 * HWp + 2 * C * max(Cr, 1) + 128) * 4
    return io + planes + gate + consts


def _pick_bt(B, C, HWp, Cr, itemsize):
    budget = 48 * 1024 * 1024                  # headroom inside v7x's 64 MiB VMEM
    min_grid = min(4, B)                       # >= 2 steps per TensorCore on 2-TC chips
    best = 1
    for bt in range(1, B + 1):
        if B % bt:
            continue
        if B // bt < min_grid:
            continue
        if _vmem_footprint(bt, C, HWp, Cr, itemsize) <= budget:
            best = bt
    return best


def cbam_pallas(x, w1, w2, wsp, bt=None):
    """x: (B, C, H, W); w1: (Cr, C); w2: (C, Cr); wsp: (1, 2, 7, 7) OIHW."""
    B, C, H, W = x.shape
    Cr = w1.shape[0]
    assert w1.shape == (Cr, C) and w2.shape == (C, Cr)
    assert wsp.shape == (1, 2, 7, 7), "spatial-gate weight must be OIHW (1, 2, 7, 7)"
    HW = H * W
    HWp = ((HW + 127) // 128) * 128            # lane-dense spatial extent
    itemsize = jnp.dtype(x.dtype).itemsize

    if bt is None:
        bt = _pick_bt(B, C, HWp, Cr, itemsize)
    assert B % bt == 0
    # TODO(synk): add a channel-tile ("arbitrary") grid axis with VMEM-scratch
    # mx/av accumulation when even bt=1 exceeds the per-step VMEM budget.

    x3 = x.reshape(B, C, HW)                   # free view of contiguous NCHW
    if HWp != HW:
        x3 = jnp.pad(x3, ((0, 0), (0, 0), (0, HWp - HW)))

    w1t3 = jnp.asarray(w1, jnp.float32).T[None, :, :]        # (1, C, Cr)
    w2_3 = jnp.asarray(w2, jnp.float32)[None, :, :]          # (1, C, Cr)
    wsp_flat = jnp.asarray(wsp, jnp.float32).reshape(-1)     # (98,): [max taps, avg taps]

    p = np.arange(HWp, dtype=np.int64)
    col, row, valid = p % W, p // W, p < HW
    col_masks = jnp.asarray(np.stack(
        [((col + dj - 3 >= 0) & (col + dj - 3 < W) & valid).astype(np.float32)
         for dj in range(7)]))                               # (7, HWp)
    row_masks = jnp.asarray(np.stack(
        [((row + di - 3 >= 0) & (row + di - 3 < H) & valid).astype(np.float32)
         for di in range(7)]))                               # (7, HWp)

    foot = _vmem_footprint(bt, C, HWp, Cr, itemsize)
    vmem_limit = int(min(64 << 20, max(32 << 20, foot + (8 << 20))))
    cost = pl.CostEstimate(
        flops=B * HW * (6 * C + 4 * 98) + 4 * B * C * Cr,
        transcendentals=B * HW,
        bytes_accessed=2 * B * C * HWp * itemsize)

    kernel = functools.partial(cbam_kernel, H=H, W=W, roll_fwd=_roll_is_forward())

    out3 = pl.pallas_call(
        kernel,
        out_shape=jax.ShapeDtypeStruct((B, C, HWp), x.dtype),
        grid=(B // bt,),
        in_specs=[
            pl.BlockSpec((bt, C, HWp), lambda b: (b, 0, 0)),
            pl.BlockSpec((1, C, Cr), lambda b: (0, 0, 0)),
            pl.BlockSpec((1, C, Cr), lambda b: (0, 0, 0)),
            pl.BlockSpec((7, HWp), lambda b: (0, 0)),
            pl.BlockSpec((7, HWp), lambda b: (0, 0)),
            pl.BlockSpec(memory_space=pltpu.MemorySpace.SMEM),
        ],
        out_specs=pl.BlockSpec((bt, C, HWp), lambda b: (b, 0, 0)),
        compiler_params=pltpu.CompilerParams(
            dimension_semantics=("parallel",),
            vmem_limit_bytes=vmem_limit),
        cost_estimate=cost,
    )(x3, w1t3, w2_3, col_masks, row_masks, wsp_flat)

    if HWp != HW:
        out3 = out3[:, :, :HW]
    return out3.reshape(B, C, H, W)


def cbam_reference(x, w1, w2, wsp):
    """Pure-JAX reference matching the PyTorch forward."""
    hi = jax.lax.Precision.HIGHEST
    pooled = x.mean(axis=(2, 3))                                      # (B, C)
    hidden = jnp.maximum(jax.lax.dot(pooled, w1.T, precision=hi), 0.0)
    att = jax.lax.dot(hidden, w2.T, precision=hi)                     # (B, C)
    ch = jnp.clip(att / 6.0 + 0.5, 0.0, 1.0)                          # Hardsigmoid
    x_ca = x * ch[:, :, None, None]
    mx = x_ca.max(axis=1, keepdims=True)
    av = x_ca.mean(axis=1, keepdims=True)
    sp_in = jnp.concatenate([mx, av], axis=1)                         # (B, 2, H, W)
    conv = jax.lax.conv_general_dilated(
        sp_in, wsp, window_strides=(1, 1), padding=((3, 3), (3, 3)),
        dimension_numbers=("NCHW", "OIHW", "NCHW"), precision=hi)
    return x_ca * jax.nn.sigmoid(conv)


if __name__ == "__main__":
    B, C, H, W = 8, 32, 16, 16
    reduction = 16
    Cr = C // reduction

    key = jax.random.PRNGKey(0)
    kx, k1, k2, k3 = jax.random.split(key, 4)
    x = jax.random.normal(kx, (B, C, H, W), dtype=jnp.float32)
    w1 = jax.random.normal(k1, (Cr, C), dtype=jnp.float32) * 0.1      # conv1 (Cr,C,1,1) squeezed
    w2 = jax.random.normal(k2, (C, Cr), dtype=jnp.float32) * 0.1      # conv2 (C,Cr,1,1) squeezed
    wsp = jax.random.normal(k3, (1, 2, 7, 7), dtype=jnp.float32) * 0.1

    out = cbam_pallas(x, w1, w2, wsp)
    jax.block_until_ready(out)

    ref = cbam_reference(x, w1, w2, wsp)
    jax.block_until_ready(ref)

    np.testing.assert_allclose(np.asarray(out), np.asarray(ref), rtol=2e-4, atol=2e-5)
    print("KERNEL_OK")
</pallas_src>

<mosaic_0001>
module attributes {stable_mosaic.version = 11 : i64} {
  func.func @probe(%arg0: memref<8x128xf32, #tpu.memory_space<vmem>>, %arg1: memref<8x128xf32, #tpu.memory_space<vmem>>) attributes {dimension_semantics = [], scalar_prefetch = 0 : i64, scratch_operands = 0 : i64, tpu.core_type = #tpu.core_type<tc>} {
    %c0 = arith.constant 0 : index
    %c0_0 = arith.constant 0 : index
    %0 = vector.load %arg0[%c0, %c0_0] : memref<8x128xf32, #tpu.memory_space<vmem>>, vector<8x128xf32>
    %c1_i32 = arith.constant 1 : i32
    %1 = tpu.dynamic_rotate %0 by %c1_i32 dim 1 : vector<8x128xf32>, i32 -> vector<8x128xf32>
    %c0_1 = arith.constant 0 : index
    %c0_2 = arith.constant 0 : index
    %2 = vector.load %arg1[%c0_1, %c0_2] : memref<8x128xf32, #tpu.memory_space<vmem>>, vector<8x128xf32>
    tpu.vector_store %arg1[%c0_1, %c0_2], %1 {strides = array<i32>} : memref<8x128xf32, #tpu.memory_space<vmem>>, vector<8x128xf32>,
    return
  }
}

</mosaic_0001>

<bundles_post_ra>
// kernel: tpu_custom_call.1
= control target key start
LH: loop header
LB: loop body
LE: loop exit
PB: predicated region body
PF: predicated region fallthrough
CT: control target
= control target key end

     0   :  { %6 = vsyncpa [#allocation3], 0  ;;  %s118_s0 = inlined_call_operand.hbm [shape: f32[8,128], index: 0, kind: input, shape index: {}]   ;;  %s119_s1 = inlined_call_operand.hbm [shape: f32[8,128], index: 1, kind: output, shape index: {}]  }
   0x1   :  { %7 = vsyncpa [#allocation4], 0  ;;  %s13_s8 = sshll.u32 %s118_s0, 4  ;;  %s99_s9 = smov [#allocation2]   ;;  %s14_s8 = int_to_ptr.hbm [resolvable:$true] %s13_s8 }
   0x2   :  { %s15_s10 = sshll.u32 %s99_s9, 4  ;;  %s16_s10 = int_to_ptr.vmem [resolvable:$true] %s15_s10 }
   0x3   :  { %18 = dma.hbm_to_vmem [thread:$0]  %s14_s8, 128, %s16_s10, [#allocation3]  }
   0x4   :  { %95 = dma.done.wait [#allocation3], 128  }
   0x5   :  { %96 = vsyncadd [#allocation3], 4294967168  ;;  %v23_v0 = vld [vmem:[#allocation2] sm:$0xff]  ;;  %s100_s11 = smov 1   ;;  %s101_s12 = smov [#allocation5]  }
   0x6   :  { %24 = vrot.lane.b32.xlu0 %v23_v0, %s100_s11  ;;  %s32_s13 = sshll.u32 %s101_s12, 4  ;;  %s34_s16 = sshll.u32 %s119_s1, 4  ;;  %s33_s13 = int_to_ptr.vmem [resolvable:$true] %s32_s13  ;;  %s35_s16 = int_to_ptr.hbm [resolvable:$true] %s34_s16 }
  0x78   :  { %v25_v1 = vpop.permute.xlu0 %24 }
  0x79   :  { %26 = vst [vmem:[#allocation5] sm:$0xff] %v25_v1 }
  0x7a   :  { %37 = dma.vmem_to_hbm [thread:$0]  %s33_s13, 128, %s35_s16, [#allocation4]  }
  0x7b   :  { %97 = dma.done.wait [#allocation4], 128  }
  0x7c   :  { %98 = vsyncadd [#allocation4], 4294967168 }
  0x7d   :  { %42 = vsyncpa [#allocation3], 1 }
  0x7e   :  { %43 = vsyncpa [#allocation4], 1 }

</bundles_post_ra>
